<compile_context>
chip_gen: v7x
topology: tpu7x:2x2x1
jax: 0.10.0
libtpu: 0.0.40
codegen_flags: <defaults>
</compile_context>

<pallas_src>
import jax
import jax.numpy as jnp
from jax.experimental import pallas as pl
from jax.experimental.pallas import tpu as pltpu


_LANE = 128
_SMALL_BYTES = 256 * 1024      # below this, let XLA fuse a plain elementwise op


def _relu_kernel(x_ref, o_ref):
    x = x_ref[...]
    # exact semantics of the PyTorch module: input * (input > 0)
    o_ref[...] = x * (x > 0).astype(x.dtype)


def _relu_ref(x):
    return x * (x > 0).astype(x.dtype)


def _block_bytes_for_device():
    """~4 MiB blocks on v6e/v7x (32 MiB scoped VMEM default), ~2 MiB elsewhere (v5e: 16 MiB)."""
    try:
        kind = jax.devices()[0].device_kind.lower()
    except Exception:
        kind = ""
    if ("v6" in kind) or ("v7" in kind):
        return 4 * 1024 * 1024
    return 2 * 1024 * 1024


def _relu_2d(x2d):
    """ReLU over a (rows, width) slab, width a multiple of 128."""
    rows, width = x2d.shape
    dtype = x2d.dtype
    itemsize = jnp.dtype(dtype).itemsize
    # dtype-aware sublane multiple: 8 (f32), 16 (bf16/f16), 32 (int8/fp8)
    sublane = max(8, 32 // max(1, itemsize))
    block_bytes = _block_bytes_for_device()

    if rows <= sublane:
        # Tiny slab: a single full-array block (block dims == array dims is legal).
        tr = rows
        grid = (1,)
    else:
        # Target ~block_bytes per block, rounded to the dtype sublane multiple.
        tr = max(sublane, (block_bytes // (width * itemsize)) // sublane * sublane)
        # Never larger than the (sublane-rounded) row count.
        tr = min(tr, pl.cdiv(rows, sublane) * sublane)
        # cdiv grid: a partial last block is handled by Pallas with a masked store.
        grid = (pl.cdiv(rows, tr),)

    return pl.pallas_call(
        _relu_kernel,
        out_shape=jax.ShapeDtypeStruct((rows, width), dtype),
        grid_spec=pltpu.PrefetchScalarGridSpec(
            num_scalar_prefetch=0,
            grid=grid,
            in_specs=[pl.BlockSpec((tr, width), lambda i: (i, 0))],
            out_specs=pl.BlockSpec((tr, width), lambda i: (i, 0)),
        ),
        compiler_params=pltpu.CompilerParams(
            dimension_semantics=("parallel",),
        ),
    )(x2d)


def relu_forward(x):
    """ReLU forward matching `ReLU.forward` of the PyTorch module (any shape/dtype)."""
    orig_shape = x.shape
    n = x.size
    if n == 0:
        return x
    itemsize = jnp.dtype(x.dtype).itemsize

    # Tiny-input fast path: custom-call overhead dwarfs the memory traffic.
    if n * itemsize <= _SMALL_BYTES:
        return _relu_ref(x)

    flat = x.reshape(-1)
    main_n = (n // _LANE) * _LANE

    # Pick the widest lane-dense slab width (multiple of 128) that divides main_n.
    width = _LANE
    for w in (1024, 512, 256):
        if main_n % w == 0:
            width = w
            break
    rows = main_n // width

    if main_n == n:
        out = _relu_2d(flat.reshape(rows, width)).reshape(-1)
    else:
        # Ragged size: kernel over the lane-aligned prefix, plain jnp on the <128 tail.
        main_out = _relu_2d(flat[:main_n].reshape(rows, width)).reshape(-1)
        tail_out = _relu_ref(flat[main_n:])
        out = jnp.concatenate([main_out, tail_out])

    return out.reshape(orig_shape)


if __name__ == "__main__":
    key = jax.random.PRNGKey(0)

    # NCHW input consistent with the conv-based Miniproject2 model (small -> fast path).
    x = jax.random.normal(key, (2, 4, 16, 16), dtype=jnp.float32)
    y = jax.block_until_ready(relu_forward(x))
    assert y.shape == x.shape and y.dtype == x.dtype
    assert jnp.array_equal(y, _relu_ref(x)), "mismatch vs reference ReLU (small input)"

    # Larger input: exercises the Pallas kernel path (lane-dense multiple of 128).
    x2 = jax.random.normal(jax.random.PRNGKey(1), (4, 16, 32, 64), dtype=jnp.float32)
    y2 = jax.block_until_ready(relu_forward(x2))
    assert jnp.array_equal(y2, _relu_ref(x2)), "mismatch vs reference ReLU (kernel path)"

    # Ragged element count (> small threshold, n % 128 != 0): kernel prefix + jnp tail.
    x3 = jax.random.normal(jax.random.PRNGKey(2), (1, 3, 137, 211), dtype=jnp.float32)
    y3 = jax.block_until_ready(relu_forward(x3))
    assert jnp.array_equal(y3, _relu_ref(x3)), "mismatch vs reference ReLU (ragged path)"

    print("KERNEL_OK")
</pallas_src>

<mosaic_0001>
module attributes {stable_mosaic.version = 11 : i64} {
  func.func @_relu_kernel(%arg0: i32, %arg1: memref<128x1024xf32, #tpu.memory_space<vmem>>, %arg2: memref<128x1024xf32, #tpu.memory_space<vmem>>) attributes {dimension_semantics = [#tpu.dimension_semantics<parallel>], iteration_bounds = array<i64: 1>, scalar_prefetch = 0 : i64, scratch_operands = 0 : i64, tpu.core_type = #tpu.core_type<tc>, window_params = [{transform_indices = @transform_0, window_bounds = array<i64: 128, 1024>}, {transform_indices = @transform_1, window_bounds = array<i64: 128, 1024>}]} {
    %c0 = arith.constant 0 : index
    %c0_0 = arith.constant 0 : index
    %0 = vector.load %arg1[%c0, %c0_0] : memref<128x1024xf32, #tpu.memory_space<vmem>>, vector<128x1024xf32>
    %cst = arith.constant 0.000000e+00 : f32
    %1 = vector.broadcast %cst : f32 to vector<128x1024xf32>
    %2 = arith.cmpf ogt, %0, %1 : vector<128x1024xf32>
    %3 = arith.extui %2 : vector<128x1024xi1> to vector<128x1024xi32>
    %4 = arith.sitofp %3 : vector<128x1024xi32> to vector<128x1024xf32>
    %5 = arith.mulf %0, %4 : vector<128x1024xf32>
    %c0_1 = arith.constant 0 : index
    %c0_2 = arith.constant 0 : index
    %6 = vector.load %arg2[%c0_1, %c0_2] : memref<128x1024xf32, #tpu.memory_space<vmem>>, vector<128x1024xf32>
    tpu.vector_store %arg2[%c0_1, %c0_2], %5 {strides = array<i32>} : memref<128x1024xf32, #tpu.memory_space<vmem>>, vector<128x1024xf32>,
    return
  }
  func.func @transform_0(%arg0: i32) -> (i32, i32) {
    %c0_i32 = arith.constant 0 : i32
    %c0_i32_0 = arith.constant 0 : i32
    return %arg0, %c0_i32 : i32, i32
  }
  func.func @transform_1(%arg0: i32) -> (i32, i32) {
    %c0_i32 = arith.constant 0 : i32
    %c0_i32_0 = arith.constant 0 : i32
    return %arg0, %c0_i32 : i32, i32
  }
}

</mosaic_0001>

<bundles_post_ra>
// kernel: tpu_custom_call.1
= control target key start
LH: loop header
LB: loop body
LE: loop exit
PB: predicated region body
PF: predicated region fallthrough
CT: control target
= control target key end

     0   :  { %6 = vsyncpa [#allocation3], 0  ;;  %s1162_s0 = inlined_call_operand.hbm [shape: f32[128,1024], index: 0, kind: input, shape index: {}]   ;;  %s1163_s1 = inlined_call_operand.hbm [shape: f32[128,1024], index: 1, kind: output, shape index: {}]  }
   0x1   :  { %7 = vsyncpa [#allocation4], 0  ;;  %s989_s6 = smov [#allocation2]   ;;  %s941_s10 = scalar_lea.hbm %s1162_s0, 16384 }
   0x2   :  { %s13_s7 = sshll.u32 %s989_s6, 4  ;;  %p942_p0 = scmp.ne.s32.totalorder %s1162_s0, %s941_s10  ;;  %s14_s7 = int_to_ptr.vmem [resolvable:$true] %s13_s7 }
   0x3   :  { %p945_p1 = scmp.lt.u32.totalorder %s941_s10, %s1162_s0 }
   0x5   :  { %p947_p2 = pnand %p945_p1, %p942_p0 }
   0x7   :  { %950 = shalt.err (!%p947_p2)
}
   0x8   :  { %s951_s15 = scalar_lea.vmem %s14_s7, 16384  ;;  %p956_p4 = scmp.lt.s32.totalorder %s14_s7, %s14_s7 }
   0x9   :  { %p952_p3 = scmp.ne.s32.totalorder %s14_s7, %s951_s15  ;;  %p957_p5 = scmp.lt.s32.totalorder %s951_s15, %s951_s15 }
   0xb   :  { %p958_p6 = por %p957_p5, %p956_p4 }
   0xd   :  { %p959_p7 = pnand %p958_p6, %p952_p3 }
   0xf   :  { %962 = shalt.err (!%p959_p7)
}
  0x10   :  { %s990_s16 = smov 1024   ;;  %s991_s17 = smov 64  }
  0x11   :  { %19 = dma.hbm_to_vmem [thread:$0]  %s1162_s0, 16384, %s14_s7, [#allocation3], %s990_s16, %s990_s16, %s991_s17  }
  0x12   :  { %985 = dma.done.wait [#allocation3], 16384  }
  0x13   :  { %986 = vsyncadd [#allocation3], 4294950912  ;;  %v23_v0 = vld [vmem:[#allocation2] sm:$0xff]  ;;  %v24_v1 = vld [vmem:[#allocation2 + $0x8] sm:$0xff]  ;;  %v992_v6 = vmov 0.0   ;;  %s993_s0 = smov [#allocation5]  }
  0x14   :  { %v25_v2 = vld [vmem:[#allocation2 + $0x10] sm:$0xff]  ;;  %vm151_vm0 = vcmp.gt.f32.partialorder %v23_v0, 0.0  ;;  %vm152_vm1 = vcmp.gt.f32.partialorder %v24_v1, 0.0  ;;  %v26_v3 = vld [vmem:[#allocation2 + $0x18] sm:$0xff]  ;;  %v27_v4 = vld [vmem:[#allocation2 + $0x20] sm:$0xff]  ;;  %s796_s20 = sshll.u32 %s993_s0, 4  ;;  %s797_s20 = int_to_ptr.vmem [resolvable:$true] %s796_s20 }
  0x15   :  { %vm153_vm2 = vcmp.gt.f32.partialorder %v25_v2, 0.0  ;;  %v28_v5 = vld [vmem:[#allocation2 + $0x28] sm:$0xff]  ;;  %v808_v7 = vsel %vm151_vm0, 1.0, %v992_v6  ;;  %v809_v8 = vsel %vm152_vm1, 1.0, %v992_v6  ;;  %vm154_vm3 = vcmp.gt.f32.partialorder %v26_v3, 0.0  ;;  %v29_v10 = vld [vmem:[#allocation2 + $0x30] sm:$0xff]  ;;  %p968_p9 = scmp.lt.s32.totalorder %s797_s20, %s797_s20 }
  0x16   :  { %v810_v9 = vsel %vm153_vm2, 1.0, %v992_v6  ;;  %v30_v11 = vld [vmem:[#allocation2 + $0x38] sm:$0xff]  ;;  %v535_v12 = vmul.f32 %v808_v7, %v23_v0  ;;  %v536_v13 = vmul.f32 %v809_v8, %v24_v1  ;;  %v811_v15 = vsel %vm154_vm3, 1.0, %v992_v6  ;;  %v31_v17 = vld [vmem:[#allocation2 + $0x40] sm:$0xff]  ;;  %v32_v18 = vld [vmem:[#allocation2 + $0x48] sm:$0xff]  ;;  %s963_s21 = scalar_lea.vmem %s797_s20, 16384 }
  0x17   :  { %v537_v14 = vmul.f32 %v810_v9, %v25_v2  ;;  %v538_v16 = vmul.f32 %v811_v15, %v26_v3  ;;  %vm155_vm4 = vcmp.gt.f32.partialorder %v27_v4, 0.0  ;;  %vm156_vm5 = vcmp.gt.f32.partialorder %v28_v5, 0.0  ;;  %v33_v19 = vld [vmem:[#allocation2 + $0x50] sm:$0xff]  ;;  %v34_v23 = vld [vmem:[#allocation2 + $0x58] sm:$0xff]  ;;  %v35_v29 = vld [vmem:[#allocation2 + $0x60] sm:$0xff]  ;;  %p964_p8 = scmp.ne.s32.totalorder %s797_s20, %s963_s21  ;;  %p969_p10 = scmp.lt.s32.totalorder %s963_s21, %s963_s21 }
  0x18   :  { %vm157_vm6 = vcmp.gt.f32.partialorder %v29_v10, 0.0  ;;  %663 = vst [vmem:[#allocation5] sm:$0xff] %v535_v12  ;;  %664 = vst [vmem:[#allocation5 + $0x8] sm:$0xff] %v536_v13  ;;  %v812_v20 = vsel %vm155_vm4, 1.0, %v992_v6  ;;  %v813_v21 = vsel %vm156_vm5, 1.0, %v992_v6  ;;  %vm158_vm7 = vcmp.gt.f32.partialorder %v30_v11, 0.0 }
  0x19   :  { %665 = vst [vmem:[#allocation5 + $0x10] sm:$0xff] %v537_v14  ;;  %v814_v22 = vsel %vm157_vm6, 1.0, %v992_v6  ;;  %666 = vst [vmem:[#allocation5 + $0x18] sm:$0xff] %v538_v16  ;;  %v539_v24 = vmul.f32 %v812_v20, %v27_v4  ;;  %v540_v25 = vmul.f32 %v813_v21, %v28_v5  ;;  %v815_v27 = vsel %vm158_vm7, 1.0, %v992_v6  ;;  %v36_v30 = vld [vmem:[#allocation2 + $0x68] sm:$0xff]  ;;  %v37_v31 = vld [vmem:[#allocation2 + $0x70] sm:$0xff]  ;;  %p970_p11 = por %p969_p10, %p968_p9 }
  0x1a   :  { %v541_v26 = vmul.f32 %v814_v22, %v29_v10  ;;  %v542_v28 = vmul.f32 %v815_v27, %v30_v11  ;;  %vm159_vm8 = vcmp.gt.f32.partialorder %v31_v17, 0.0  ;;  %vm160_vm9 = vcmp.gt.f32.partialorder %v32_v18, 0.0  ;;  %v38_v35 = vld [vmem:[#allocation2 + $0x78] sm:$0xff]  ;;  %v39_v41 = vld [vmem:[#allocation2 + $0x80] sm:$0xff]  ;;  %v40_v42 = vld [vmem:[#allocation2 + $0x88] sm:$0xff] }
  0x1b   :  { %vm161_vm10 = vcmp.gt.f32.partialorder %v33_v19, 0.0  ;;  %667 = vst [vmem:[#allocation5 + $0x20] sm:$0xff] %v539_v24  ;;  %668 = vst [vmem:[#allocation5 + $0x28] sm:$0xff] %v540_v25  ;;  %v816_v32 = vsel %vm159_vm8, 1.0, %v992_v6  ;;  %v817_v33 = vsel %vm160_vm9, 1.0, %v992_v6  ;;  %vm162_vm11 = vcmp.gt.f32.partialorder %v34_v23, 0.0  ;;  %p971_p12 = pnand %p970_p11, %p964_p8 }
  0x1c   :  { %669 = vst [vmem:[#allocation5 + $0x30] sm:$0xff] %v541_v26  ;;  %v818_v34 = vsel %vm161_vm10, 1.0, %v992_v6  ;;  %670 = vst [vmem:[#allocation5 + $0x38] sm:$0xff] %v542_v28  ;;  %v543_v36 = vmul.f32 %v816_v32, %v31_v17  ;;  %v544_v37 = vmul.f32 %v817_v33, %v32_v18  ;;  %v819_v39 = vsel %vm162_vm11, 1.0, %v992_v6  ;;  %v41_v43 = vld [vmem:[#allocation2 + $0x90] sm:$0xff]  ;;  %v42_v47 = vld [vmem:[#allocation2 + $0x98] sm:$0xff] }
  0x1d   :  { %v545_v38 = vmul.f32 %v818_v34, %v33_v19  ;;  %v546_v40 = vmul.f32 %v819_v39, %v34_v23  ;;  %vm163_vm12 = vcmp.gt.f32.partialorder %v35_v29, 0.0  ;;  %vm164_vm13 = vcmp.gt.f32.partialorder %v36_v30, 0.0  ;;  %v43_v53 = vld [vmem:[#allocation2 + $0xa0] sm:$0xff]  ;;  %v44_v54 = vld [vmem:[#allocation2 + $0xa8] sm:$0xff]  ;;  %v45_v55 = vld [vmem:[#allocation2 + $0xb0] sm:$0xff] }
  0x1e   :  { %vm165_vm14 = vcmp.gt.f32.partialorder %v37_v31, 0.0  ;;  %671 = vst [vmem:[#allocation5 + $0x40] sm:$0xff] %v543_v36  ;;  %672 = vst [vmem:[#allocation5 + $0x48] sm:$0xff] %v544_v37  ;;  %v820_v44 = vsel %vm163_vm12, 1.0, %v992_v6  ;;  %v821_v45 = vsel %vm164_vm13, 1.0, %v992_v6  ;;  %vm166_vm15 = vcmp.gt.f32.partialorder %v38_v35, 0.0 }
  0x1f   :  { %673 = vst [vmem:[#allocation5 + $0x50] sm:$0xff] %v545_v38  ;;  %v822_v46 = vsel %vm165_vm14, 1.0, %v992_v6  ;;  %674 = vst [vmem:[#allocation5 + $0x58] sm:$0xff] %v546_v40  ;;  %v547_v48 = vmul.f32 %v820_v44, %v35_v29  ;;  %v548_v49 = vmul.f32 %v821_v45, %v36_v30  ;;  %v823_v51 = vsel %vm166_vm15, 1.0, %v992_v6  ;;  %v46_v59 = vld [vmem:[#allocation2 + $0xb8] sm:$0xff]  ;;  %v47_v1 = vld [vmem:[#allocation2 + $0xc0] sm:$0xff] }
  0x20   :  { %v549_v50 = vmul.f32 %v822_v46, %v37_v31  ;;  %v550_v52 = vmul.f32 %v823_v51, %v38_v35  ;;  %vm167_vm0 = vcmp.gt.f32.partialorder %v39_v41, 0.0  ;;  %vm168_vm1 = vcmp.gt.f32.partialorder %v40_v42, 0.0  ;;  %v48_v2 = vld [vmem:[#allocation2 + $0xc8] sm:$0xff]  ;;  %v49_v3 = vld [vmem:[#allocation2 + $0xd0] sm:$0xff]  ;;  %v50_v8 = vld [vmem:[#allocation2 + $0xd8] sm:$0xff] }
  0x21   :  { %vm169_vm2 = vcmp.gt.f32.partialorder %v41_v43, 0.0  ;;  %675 = vst [vmem:[#allocation5 + $0x60] sm:$0xff] %v547_v48  ;;  %676 = vst [vmem:[#allocation5 + $0x68] sm:$0xff] %v548_v49  ;;  %v824_v56 = vsel %vm167_vm0, 1.0, %v992_v6  ;;  %v825_v57 = vsel %vm168_vm1, 1.0, %v992_v6  ;;  %vm170_vm3 = vcmp.gt.f32.partialorder %v42_v47, 0.0 }
  0x22   :  { %677 = vst [vmem:[#allocation5 + $0x70] sm:$0xff] %v549_v50  ;;  %v826_v58 = vsel %vm169_vm2, 1.0, %v992_v6  ;;  %678 = vst [vmem:[#allocation5 + $0x78] sm:$0xff] %v550_v52  ;;  %v551_v60 = vmul.f32 %v824_v56, %v39_v41  ;;  %v552_v61 = vmul.f32 %v825_v57, %v40_v42  ;;  %v827_v63 = vsel %vm170_vm3, 1.0, %v992_v6  ;;  %v51_v14 = vld [vmem:[#allocation2 + $0xe0] sm:$0xff]  ;;  %v52_v15 = vld [vmem:[#allocation2 + $0xe8] sm:$0xff] }
  0x23   :  { %v553_v62 = vmul.f32 %v826_v58, %v41_v43  ;;  %v554_v0 = vmul.f32 %v827_v63, %v42_v47  ;;  %vm171_vm4 = vcmp.gt.f32.partialorder %v43_v53, 0.0  ;;  %vm172_vm5 = vcmp.gt.f32.partialorder %v44_v54, 0.0  ;;  %v53_v16 = vld [vmem:[#allocation2 + $0xf0] sm:$0xff]  ;;  %v54_v20 = vld [vmem:[#allocation2 + $0xf8] sm:$0xff]  ;;  %v55_v26 = vld [vmem:[#allocation2 + $0x100] sm:$0xff] }
  0x24   :  { %vm173_vm6 = vcmp.gt.f32.partialorder %v45_v55, 0.0  ;;  %679 = vst [vmem:[#allocation5 + $0x80] sm:$0xff] %v551_v60  ;;  %680 = vst [vmem:[#allocation5 + $0x88] sm:$0xff] %v552_v61  ;;  %v828_v4 = vsel %vm171_vm4, 1.0, %v992_v6  ;;  %v829_v5 = vsel %vm172_vm5, 1.0, %v992_v6  ;;  %vm174_vm7 = vcmp.gt.f32.partialorder %v46_v59, 0.0 }
  0x25   :  { %681 = vst [vmem:[#allocation5 + $0x90] sm:$0xff] %v553_v62  ;;  %v830_v7 = vsel %vm173_vm6, 1.0, %v992_v6  ;;  %682 = vst [vmem:[#allocation5 + $0x98] sm:$0xff] %v554_v0  ;;  %v555_v9 = vmul.f32 %v828_v4, %v43_v53  ;;  %v556_v10 = vmul.f32 %v829_v5, %v44_v54  ;;  %v831_v12 = vsel %vm174_vm7, 1.0, %v992_v6  ;;  %v56_v27 = vld [vmem:[#allocation2 + $0x108] sm:$0xff]  ;;  %v57_v28 = vld [vmem:[#allocation2 + $0x110] sm:$0xff] }
  0x26   :  { %v557_v11 = vmul.f32 %v830_v7, %v45_v55  ;;  %v558_v13 = vmul.f32 %v831_v12, %v46_v59  ;;  %vm175_vm8 = vcmp.gt.f32.partialorder %v47_v1, 0.0  ;;  %vm176_vm9 = vcmp.gt.f32.partialorder %v48_v2, 0.0  ;;  %v58_v32 = vld [vmem:[#allocation2 + $0x118] sm:$0xff]  ;;  %v59_v38 = vld [vmem:[#allocation2 + $0x120] sm:$0xff]  ;;  %v60_v39 = vld [vmem:[#allocation2 + $0x128] sm:$0xff] }
  0x27   :  { %vm177_vm10 = vcmp.gt.f32.partialorder %v49_v3, 0.0  ;;  %683 = vst [vmem:[#allocation5 + $0xa0] sm:$0xff] %v555_v9  ;;  %684 = vst [vmem:[#allocation5 + $0xa8] sm:$0xff] %v556_v10  ;;  %v832_v17 = vsel %vm175_vm8, 1.0, %v992_v6  ;;  %v833_v18 = vsel %vm176_vm9, 1.0, %v992_v6  ;;  %vm178_vm11 = vcmp.gt.f32.partialorder %v50_v8, 0.0 }
  0x28   :  { %685 = vst [vmem:[#allocation5 + $0xb0] sm:$0xff] %v557_v11  ;;  %v834_v19 = vsel %vm177_vm10, 1.0, %v992_v6  ;;  %686 = vst [vmem:[#allocation5 + $0xb8] sm:$0xff] %v558_v13  ;;  %v559_v21 = vmul.f32 %v832_v17, %v47_v1  ;;  %v560_v22 = vmul.f32 %v833_v18, %v48_v2  ;;  %v835_v24 = vsel %vm178_vm11, 1.0, %v992_v6  ;;  %v61_v40 = vld [vmem:[#allocation2 + $0x130] sm:$0xff]  ;;  %v62_v44 = vld [vmem:[#allocation2 + $0x138] sm:$0xff] }
  0x29   :  { %v561_v23 = vmul.f32 %v834_v19, %v49_v3  ;;  %v562_v25 = vmul.f32 %v835_v24, %v50_v8  ;;  %vm179_vm12 = vcmp.gt.f32.partialorder %v51_v14, 0.0  ;;  %vm180_vm13 = vcmp.gt.f32.partialorder %v52_v15, 0.0  ;;  %v63_v50 = vld [vmem:[#allocation2 + $0x140] sm:$0xff]  ;;  %v64_v51 = vld [vmem:[#allocation2 + $0x148] sm:$0xff]  ;;  %v65_v52 = vld [vmem:[#allocation2 + $0x150] sm:$0xff] }
  0x2a   :  { %vm181_vm14 = vcmp.gt.f32.partialorder %v53_v16, 0.0  ;;  %687 = vst [vmem:[#allocation5 + $0xc0] sm:$0xff] %v559_v21  ;;  %688 = vst [vmem:[#allocation5 + $0xc8] sm:$0xff] %v560_v22  ;;  %v836_v29 = vsel %vm179_vm12, 1.0, %v992_v6  ;;  %v837_v30 = vsel %vm180_vm13, 1.0, %v992_v6  ;;  %vm182_vm15 = vcmp.gt.f32.partialorder %v54_v20, 0.0 }
  0x2b   :  { %689 = vst [vmem:[#allocation5 + $0xd0] sm:$0xff] %v561_v23  ;;  %v838_v31 = vsel %vm181_vm14, 1.0, %v992_v6  ;;  %690 = vst [vmem:[#allocation5 + $0xd8] sm:$0xff] %v562_v25  ;;  %v563_v33 = vmul.f32 %v836_v29, %v51_v14  ;;  %v564_v34 = vmul.f32 %v837_v30, %v52_v15  ;;  %v839_v36 = vsel %vm182_vm15, 1.0, %v992_v6  ;;  %v66_v56 = vld [vmem:[#allocation2 + $0x158] sm:$0xff]  ;;  %v67_v62 = vld [vmem:[#allocation2 + $0x160] sm:$0xff] }
  0x2c   :  { %v565_v35 = vmul.f32 %v838_v31, %v53_v16  ;;  %v566_v37 = vmul.f32 %v839_v36, %v54_v20  ;;  %vm183_vm0 = vcmp.gt.f32.partialorder %v55_v26, 0.0  ;;  %vm184_vm1 = vcmp.gt.f32.partialorder %v56_v27, 0.0  ;;  %v68_v63 = vld [vmem:[#allocation2 + $0x168] sm:$0xff]  ;;  %v69_v0 = vld [vmem:[#allocation2 + $0x170] sm:$0xff]  ;;  %v70_v4 = vld [vmem:[#allocation2 + $0x178] sm:$0xff] }
  0x2d   :  { %vm185_vm2 = vcmp.gt.f32.partialorder %v57_v28, 0.0  ;;  %691 = vst [vmem:[#allocation5 + $0xe0] sm:$0xff] %v563_v33  ;;  %692 = vst [vmem:[#allocation5 + $0xe8] sm:$0xff] %v564_v34  ;;  %v840_v41 = vsel %vm183_vm0, 1.0, %v992_v6  ;;  %v841_v42 = vsel %vm184_vm1, 1.0, %v992_v6  ;;  %vm186_vm3 = vcmp.gt.f32.partialorder %v58_v32, 0.0 }
  0x2e   :  { %693 = vst [vmem:[#allocation5 + $0xf0] sm:$0xff] %v565_v35  ;;  %v842_v43 = vsel %vm185_vm2, 1.0, %v992_v6  ;;  %694 = vst [vmem:[#allocation5 + $0xf8] sm:$0xff] %v566_v37  ;;  %v567_v45 = vmul.f32 %v840_v41, %v55_v26  ;;  %v568_v46 = vmul.f32 %v841_v42, %v56_v27  ;;  %v843_v48 = vsel %vm186_vm3, 1.0, %v992_v6  ;;  %v71_v11 = vld [vmem:[#allocation2 + $0x180] sm:$0xff]  ;;  %v72_v12 = vld [vmem:[#allocation2 + $0x188] sm:$0xff] }
  0x2f   :  { %v569_v47 = vmul.f32 %v842_v43, %v57_v28  ;;  %v570_v49 = vmul.f32 %v843_v48, %v58_v32  ;;  %vm187_vm4 = vcmp.gt.f32.partialorder %v59_v38, 0.0  ;;  %vm188_vm5 = vcmp.gt.f32.partialorder %v60_v39, 0.0  ;;  %v73_v13 = vld [vmem:[#allocation2 + $0x190] sm:$0xff]  ;;  %v74_v17 = vld [vmem:[#allocation2 + $0x198] sm:$0xff]  ;;  %v75_v23 = vld [vmem:[#allocation2 + $0x1a0] sm:$0xff] }
  0x30   :  { %vm189_vm6 = vcmp.gt.f32.partialorder %v61_v40, 0.0  ;;  %695 = vst [vmem:[#allocation5 + $0x100] sm:$0xff] %v567_v45  ;;  %696 = vst [vmem:[#allocation5 + $0x108] sm:$0xff] %v568_v46  ;;  %v844_v53 = vsel %vm187_vm4, 1.0, %v992_v6  ;;  %v845_v54 = vsel %vm188_vm5, 1.0, %v992_v6  ;;  %vm190_vm7 = vcmp.gt.f32.partialorder %v62_v44, 0.0 }
  0x31   :  { %697 = vst [vmem:[#allocation5 + $0x110] sm:$0xff] %v569_v47  ;;  %v846_v55 = vsel %vm189_vm6, 1.0, %v992_v6  ;;  %698 = vst [vmem:[#allocation5 + $0x118] sm:$0xff] %v570_v49  ;;  %v571_v57 = vmul.f32 %v844_v53, %v59_v38  ;;  %v572_v58 = vmul.f32 %v845_v54, %v60_v39  ;;  %v847_v60 = vsel %vm190_vm7, 1.0, %v992_v6  ;;  %v76_v24 = vld [vmem:[#allocation2 + $0x1a8] sm:$0xff]  ;;  %v77_v25 = vld [vmem:[#allocation2 + $0x1b0] sm:$0xff] }
  0x32   :  { %v573_v59 = vmul.f32 %v846_v55, %v61_v40  ;;  %v574_v61 = vmul.f32 %v847_v60, %v62_v44  ;;  %vm191_vm8 = vcmp.gt.f32.partialorder %v63_v50, 0.0  ;;  %vm192_vm9 = vcmp.gt.f32.partialorder %v64_v51, 0.0  ;;  %v78_v29 = vld [vmem:[#allocation2 + $0x1b8] sm:$0xff]  ;;  %v79_v35 = vld [vmem:[#allocation2 + $0x1c0] sm:$0xff]  ;;  %v80_v36 = vld [vmem:[#allocation2 + $0x1c8] sm:$0xff] }
  0x33   :  { %vm193_vm10 = vcmp.gt.f32.partialorder %v65_v52, 0.0  ;;  %699 = vst [vmem:[#allocation5 + $0x120] sm:$0xff] %v571_v57  ;;  %700 = vst [vmem:[#allocation5 + $0x128] sm:$0xff] %v572_v58  ;;  %v848_v1 = vsel %vm191_vm8, 1.0, %v992_v6  ;;  %v849_v2 = vsel %vm192_vm9, 1.0, %v992_v6  ;;  %vm194_vm11 = vcmp.gt.f32.partialorder %v66_v56, 0.0 }
  0x34   :  { %701 = vst [vmem:[#allocation5 + $0x130] sm:$0xff] %v573_v59  ;;  %v850_v3 = vsel %vm193_vm10, 1.0, %v992_v6  ;;  %702 = vst [vmem:[#allocation5 + $0x138] sm:$0xff] %v574_v61  ;;  %v575_v5 = vmul.f32 %v848_v1, %v63_v50  ;;  %v576_v7 = vmul.f32 %v849_v2, %v64_v51  ;;  %v851_v9 = vsel %vm194_vm11, 1.0, %v992_v6  ;;  %v81_v37 = vld [vmem:[#allocation2 + $0x1d0] sm:$0xff]  ;;  %v82_v41 = vld [vmem:[#allocation2 + $0x1d8] sm:$0xff] }
  0x35   :  { %v577_v8 = vmul.f32 %v850_v3, %v65_v52  ;;  %v578_v10 = vmul.f32 %v851_v9, %v66_v56  ;;  %vm195_vm12 = vcmp.gt.f32.partialorder %v67_v62, 0.0  ;;  %vm196_vm13 = vcmp.gt.f32.partialorder %v68_v63, 0.0  ;;  %v83_v47 = vld [vmem:[#allocation2 + $0x1e0] sm:$0xff]  ;;  %v84_v48 = vld [vmem:[#allocation2 + $0x1e8] sm:$0xff]  ;;  %v85_v49 = vld [vmem:[#allocation2 + $0x1f0] sm:$0xff] }
  0x36   :  { %vm197_vm14 = vcmp.gt.f32.partialorder %v69_v0, 0.0  ;;  %703 = vst [vmem:[#allocation5 + $0x140] sm:$0xff] %v575_v5  ;;  %704 = vst [vmem:[#allocation5 + $0x148] sm:$0xff] %v576_v7  ;;  %v852_v14 = vsel %vm195_vm12, 1.0, %v992_v6  ;;  %v853_v15 = vsel %vm196_vm13, 1.0, %v992_v6  ;;  %vm198_vm15 = vcmp.gt.f32.partialorder %v70_v4, 0.0 }
  0x37   :  { %705 = vst [vmem:[#allocation5 + $0x150] sm:$0xff] %v577_v8  ;;  %v854_v16 = vsel %vm197_vm14, 1.0, %v992_v6  ;;  %706 = vst [vmem:[#allocation5 + $0x158] sm:$0xff] %v578_v10  ;;  %v579_v18 = vmul.f32 %v852_v14, %v67_v62  ;;  %v580_v19 = vmul.f32 %v853_v15, %v68_v63  ;;  %v855_v21 = vsel %vm198_vm15, 1.0, %v992_v6  ;;  %v86_v53 = vld [vmem:[#allocation2 + $0x1f8] sm:$0xff]  ;;  %v87_v59 = vld [vmem:[#allocation2 + $0x200] sm:$0xff] }
  0x38   :  { %v581_v20 = vmul.f32 %v854_v16, %v69_v0  ;;  %v582_v22 = vmul.f32 %v855_v21, %v70_v4  ;;  %vm199_vm0 = vcmp.gt.f32.partialorder %v71_v11, 0.0  ;;  %vm200_vm1 = vcmp.gt.f32.partialorder %v72_v12, 0.0  ;;  %v88_v60 = vld [vmem:[#allocation2 + $0x208] sm:$0xff]  ;;  %v89_v61 = vld [vmem:[#allocation2 + $0x210] sm:$0xff]  ;;  %v90_v1 = vld [vmem:[#allocation2 + $0x218] sm:$0xff] }
  0x39   :  { %vm201_vm2 = vcmp.gt.f32.partialorder %v73_v13, 0.0  ;;  %707 = vst [vmem:[#allocation5 + $0x160] sm:$0xff] %v579_v18  ;;  %708 = vst [vmem:[#allocation5 + $0x168] sm:$0xff] %v580_v19  ;;  %v856_v26 = vsel %vm199_vm0, 1.0, %v992_v6  ;;  %v857_v27 = vsel %vm200_vm1, 1.0, %v992_v6  ;;  %vm202_vm3 = vcmp.gt.f32.partialorder %v74_v17, 0.0 }
  0x3a   :  { %709 = vst [vmem:[#allocation5 + $0x170] sm:$0xff] %v581_v20  ;;  %v858_v28 = vsel %vm201_vm2, 1.0, %v992_v6  ;;  %710 = vst [vmem:[#allocation5 + $0x178] sm:$0xff] %v582_v22  ;;  %v583_v30 = vmul.f32 %v856_v26, %v71_v11  ;;  %v584_v31 = vmul.f32 %v857_v27, %v72_v12  ;;  %v859_v33 = vsel %vm202_vm3, 1.0, %v992_v6  ;;  %v91_v8 = vld [vmem:[#allocation2 + $0x220] sm:$0xff]  ;;  %v92_v9 = vld [vmem:[#allocation2 + $0x228] sm:$0xff] }
  0x3b   :  { %v585_v32 = vmul.f32 %v858_v28, %v73_v13  ;;  %v586_v34 = vmul.f32 %v859_v33, %v74_v17  ;;  %vm203_vm4 = vcmp.gt.f32.partialorder %v75_v23, 0.0  ;;  %vm204_vm5 = vcmp.gt.f32.partialorder %v76_v24, 0.0  ;;  %v93_v10 = vld [vmem:[#allocation2 + $0x230] sm:$0xff]  ;;  %v94_v14 = vld [vmem:[#allocation2 + $0x238] sm:$0xff]  ;;  %v95_v20 = vld [vmem:[#allocation2 + $0x240] sm:$0xff] }
  0x3c   :  { %vm205_vm6 = vcmp.gt.f32.partialorder %v77_v25, 0.0  ;;  %711 = vst [vmem:[#allocation5 + $0x180] sm:$0xff] %v583_v30  ;;  %712 = vst [vmem:[#allocation5 + $0x188] sm:$0xff] %v584_v31  ;;  %v860_v38 = vsel %vm203_vm4, 1.0, %v992_v6  ;;  %v861_v39 = vsel %vm204_vm5, 1.0, %v992_v6  ;;  %vm206_vm7 = vcmp.gt.f32.partialorder %v78_v29, 0.0 }
  0x3d   :  { %713 = vst [vmem:[#allocation5 + $0x190] sm:$0xff] %v585_v32  ;;  %v862_v40 = vsel %vm205_vm6, 1.0, %v992_v6  ;;  %714 = vst [vmem:[#allocation5 + $0x198] sm:$0xff] %v586_v34  ;;  %v587_v42 = vmul.f32 %v860_v38, %v75_v23  ;;  %v588_v43 = vmul.f32 %v861_v39, %v76_v24  ;;  %v863_v45 = vsel %vm206_vm7, 1.0, %v992_v6  ;;  %v96_v21 = vld [vmem:[#allocation2 + $0x248] sm:$0xff]  ;;  %v97_v22 = vld [vmem:[#allocation2 + $0x250] sm:$0xff] }
  0x3e   :  { %v589_v44 = vmul.f32 %v862_v40, %v77_v25  ;;  %v590_v46 = vmul.f32 %v863_v45, %v78_v29  ;;  %vm207_vm8 = vcmp.gt.f32.partialorder %v79_v35, 0.0  ;;  %vm208_vm9 = vcmp.gt.f32.partialorder %v80_v36, 0.0  ;;  %v98_v26 = vld [vmem:[#allocation2 + $0x258] sm:$0xff]  ;;  %v99_v32 = vld [vmem:[#allocation2 + $0x260] sm:$0xff]  ;;  %v100_v33 = vld [vmem:[#allocation2 + $0x268] sm:$0xff] }
  0x3f   :  { %vm209_vm10 = vcmp.gt.f32.partialorder %v81_v37, 0.0  ;;  %715 = vst [vmem:[#allocation5 + $0x1a0] sm:$0xff] %v587_v42  ;;  %716 = vst [vmem:[#allocation5 + $0x1a8] sm:$0xff] %v588_v43  ;;  %v864_v50 = vsel %vm207_vm8, 1.0, %v992_v6  ;;  %v865_v51 = vsel %vm208_vm9, 1.0, %v992_v6  ;;  %vm210_vm11 = vcmp.gt.f32.partialorder %v82_v41, 0.0 }
  0x40   :  { %717 = vst [vmem:[#allocation5 + $0x1b0] sm:$0xff] %v589_v44  ;;  %v866_v52 = vsel %vm209_vm10, 1.0, %v992_v6  ;;  %718 = vst [vmem:[#allocation5 + $0x1b8] sm:$0xff] %v590_v46  ;;  %v591_v54 = vmul.f32 %v864_v50, %v79_v35  ;;  %v592_v55 = vmul.f32 %v865_v51, %v80_v36  ;;  %v867_v57 = vsel %vm210_vm11, 1.0, %v992_v6  ;;  %v101_v34 = vld [vmem:[#allocation2 + $0x270] sm:$0xff]  ;;  %v102_v38 = vld [vmem:[#allocation2 + $0x278] sm:$0xff] }
  0x41   :  { %v593_v56 = vmul.f32 %v866_v52, %v81_v37  ;;  %v594_v58 = vmul.f32 %v867_v57, %v82_v41  ;;  %vm211_vm12 = vcmp.gt.f32.partialorder %v83_v47, 0.0  ;;  %vm212_vm13 = vcmp.gt.f32.partialorder %v84_v48, 0.0  ;;  %v103_v44 = vld [vmem:[#allocation2 + $0x280] sm:$0xff]  ;;  %v104_v45 = vld [vmem:[#allocation2 + $0x288] sm:$0xff]  ;;  %v105_v46 = vld [vmem:[#allocation2 + $0x290] sm:$0xff] }
  0x42   :  { %vm213_vm14 = vcmp.gt.f32.partialorder %v85_v49, 0.0  ;;  %719 = vst [vmem:[#allocation5 + $0x1c0] sm:$0xff] %v591_v54  ;;  %720 = vst [vmem:[#allocation5 + $0x1c8] sm:$0xff] %v592_v55  ;;  %v868_v62 = vsel %vm211_vm12, 1.0, %v992_v6  ;;  %v869_v63 = vsel %vm212_vm13, 1.0, %v992_v6  ;;  %vm214_vm15 = vcmp.gt.f32.partialorder %v86_v53, 0.0 }
  0x43   :  { %721 = vst [vmem:[#allocation5 + $0x1d0] sm:$0xff] %v593_v56  ;;  %v870_v0 = vsel %vm213_vm14, 1.0, %v992_v6  ;;  %722 = vst [vmem:[#allocation5 + $0x1d8] sm:$0xff] %v594_v58  ;;  %v595_v2 = vmul.f32 %v868_v62, %v83_v47  ;;  %v596_v3 = vmul.f32 %v869_v63, %v84_v48  ;;  %v871_v5 = vsel %vm214_vm15, 1.0, %v992_v6  ;;  %v106_v50 = vld [vmem:[#allocation2 + $0x298] sm:$0xff]  ;;  %v107_v56 = vld [vmem:[#allocation2 + $0x2a0] sm:$0xff] }
  0x44   :  { %v597_v4 = vmul.f32 %v870_v0, %v85_v49  ;;  %v598_v7 = vmul.f32 %v871_v5, %v86_v53  ;;  %vm215_vm0 = vcmp.gt.f32.partialorder %v87_v59, 0.0  ;;  %vm216_vm1 = vcmp.gt.f32.partialorder %v88_v60, 0.0  ;;  %v108_v57 = vld [vmem:[#allocation2 + $0x2a8] sm:$0xff]  ;;  %v109_v58 = vld [vmem:[#allocation2 + $0x2b0] sm:$0xff]  ;;  %v110_v62 = vld [vmem:[#allocation2 + $0x2b8] sm:$0xff] }
  0x45   :  { %vm217_vm2 = vcmp.gt.f32.partialorder %v89_v61, 0.0  ;;  %723 = vst [vmem:[#allocation5 + $0x1e0] sm:$0xff] %v595_v2  ;;  %724 = vst [vmem:[#allocation5 + $0x1e8] sm:$0xff] %v596_v3  ;;  %v872_v11 = vsel %vm215_vm0, 1.0, %v992_v6  ;;  %v873_v12 = vsel %vm216_vm1, 1.0, %v992_v6  ;;  %vm218_vm3 = vcmp.gt.f32.partialorder %v90_v1, 0.0 }
  0x46   :  { %725 = vst [vmem:[#allocation5 + $0x1f0] sm:$0xff] %v597_v4  ;;  %v874_v13 = vsel %vm217_vm2, 1.0, %v992_v6  ;;  %726 = vst [vmem:[#allocation5 + $0x1f8] sm:$0xff] %v598_v7  ;;  %v599_v15 = vmul.f32 %v872_v11, %v87_v59  ;;  %v600_v16 = vmul.f32 %v873_v12, %v88_v60  ;;  %v875_v18 = vsel %vm218_vm3, 1.0, %v992_v6  ;;  %v111_v4 = vld [vmem:[#allocation2 + $0x2c0] sm:$0xff]  ;;  %v112_v5 = vld [vmem:[#allocation2 + $0x2c8] sm:$0xff] }
  0x47   :  { %v601_v17 = vmul.f32 %v874_v13, %v89_v61  ;;  %v602_v19 = vmul.f32 %v875_v18, %v90_v1  ;;  %vm219_vm4 = vcmp.gt.f32.partialorder %v91_v8, 0.0  ;;  %vm220_vm5 = vcmp.gt.f32.partialorder %v92_v9, 0.0  ;;  %v113_v7 = vld [vmem:[#allocation2 + $0x2d0] sm:$0xff]  ;;  %v114_v11 = vld [vmem:[#allocation2 + $0x2d8] sm:$0xff]  ;;  %v116_v18 = vld [vmem:[#allocation2 + $0x2e8] sm:$0xff] }
  0x48   :  { %vm221_vm6 = vcmp.gt.f32.partialorder %v93_v10, 0.0  ;;  %727 = vst [vmem:[#allocation5 + $0x200] sm:$0xff] %v599_v15  ;;  %728 = vst [vmem:[#allocation5 + $0x208] sm:$0xff] %v600_v16  ;;  %v876_v23 = vsel %vm219_vm4, 1.0, %v992_v6  ;;  %v877_v24 = vsel %vm220_vm5, 1.0, %v992_v6  ;;  %vm222_vm7 = vcmp.gt.f32.partialorder %v94_v14, 0.0 }
  0x49   :  { %729 = vst [vmem:[#allocation5 + $0x210] sm:$0xff] %v601_v17  ;;  %v878_v25 = vsel %vm221_vm6, 1.0, %v992_v6  ;;  %730 = vst [vmem:[#allocation5 + $0x218] sm:$0xff] %v602_v19  ;;  %v603_v27 = vmul.f32 %v876_v23, %v91_v8  ;;  %v604_v28 = vmul.f32 %v877_v24, %v92_v9  ;;  %v879_v30 = vsel %vm222_vm7, 1.0, %v992_v6  ;;  %v115_v17 = vld [vmem:[#allocation2 + $0x2e0] sm:$0xff]  ;;  %v117_v19 = vld [vmem:[#allocation2 + $0x2f0] sm:$0xff] }
  0x4a   :  { %v605_v29 = vmul.f32 %v878_v25, %v93_v10  ;;  %v606_v31 = vmul.f32 %v879_v30, %v94_v14  ;;  %vm223_vm8 = vcmp.gt.f32.partialorder %v95_v20, 0.0  ;;  %vm224_vm9 = vcmp.gt.f32.partialorder %v96_v21, 0.0  ;;  %v118_v23 = vld [vmem:[#allocation2 + $0x2f8] sm:$0xff]  ;;  %v120_v30 = vld [vmem:[#allocation2 + $0x308] sm:$0xff] }
  0x4b   :  { %vm225_vm10 = vcmp.gt.f32.partialorder %v97_v22, 0.0  ;;  %731 = vst [vmem:[#allocation5 + $0x220] sm:$0xff] %v603_v27  ;;  %732 = vst [vmem:[#allocation5 + $0x228] sm:$0xff] %v604_v28  ;;  %v880_v35 = vsel %vm223_vm8, 1.0, %v992_v6  ;;  %v881_v36 = vsel %vm224_vm9, 1.0, %v992_v6  ;;  %vm226_vm11 = vcmp.gt.f32.partialorder %v98_v26, 0.0 }
  0x4c   :  { %733 = vst [vmem:[#allocation5 + $0x230] sm:$0xff] %v605_v29  ;;  %v882_v37 = vsel %vm225_vm10, 1.0, %v992_v6  ;;  %734 = vst [vmem:[#allocation5 + $0x238] sm:$0xff] %v606_v31  ;;  %v607_v39 = vmul.f32 %v880_v35, %v95_v20  ;;  %v608_v40 = vmul.f32 %v881_v36, %v96_v21  ;;  %v883_v42 = vsel %vm226_vm11, 1.0, %v992_v6  ;;  %v119_v29 = vld [vmem:[#allocation2 + $0x300] sm:$0xff]  ;;  %v121_v31 = vld [vmem:[#allocation2 + $0x310] sm:$0xff] }
  0x4d   :  { %v609_v41 = vmul.f32 %v882_v37, %v97_v22  ;;  %v610_v43 = vmul.f32 %v883_v42, %v98_v26  ;;  %vm227_vm12 = vcmp.gt.f32.partialorder %v99_v32, 0.0  ;;  %vm228_vm13 = vcmp.gt.f32.partialorder %v100_v33, 0.0  ;;  %v122_v35 = vld [vmem:[#allocation2 + $0x318] sm:$0xff]  ;;  %v124_v42 = vld [vmem:[#allocation2 + $0x328] sm:$0xff] }
  0x4e   :  { %vm229_vm14 = vcmp.gt.f32.partialorder %v101_v34, 0.0  ;;  %735 = vst [vmem:[#allocation5 + $0x240] sm:$0xff] %v607_v39  ;;  %736 = vst [vmem:[#allocation5 + $0x248] sm:$0xff] %v608_v40  ;;  %v884_v47 = vsel %vm227_vm12, 1.0, %v992_v6  ;;  %v885_v48 = vsel %vm228_vm13, 1.0, %v992_v6  ;;  %vm230_vm15 = vcmp.gt.f32.partialorder %v102_v38, 0.0 }
  0x4f   :  { %737 = vst [vmem:[#allocation5 + $0x250] sm:$0xff] %v609_v41  ;;  %v886_v49 = vsel %vm229_vm14, 1.0, %v992_v6  ;;  %738 = vst [vmem:[#allocation5 + $0x258] sm:$0xff] %v610_v43  ;;  %v611_v51 = vmul.f32 %v884_v47, %v99_v32  ;;  %v612_v52 = vmul.f32 %v885_v48, %v100_v33  ;;  %v887_v54 = vsel %vm230_vm15, 1.0, %v992_v6  ;;  %v123_v41 = vld [vmem:[#allocation2 + $0x320] sm:$0xff]  ;;  %v125_v43 = vld [vmem:[#allocation2 + $0x330] sm:$0xff] }
  0x50   :  { %v613_v53 = vmul.f32 %v886_v49, %v101_v34  ;;  %v614_v55 = vmul.f32 %v887_v54, %v102_v38  ;;  %vm231_vm0 = vcmp.gt.f32.partialorder %v103_v44, 0.0  ;;  %vm232_vm1 = vcmp.gt.f32.partialorder %v104_v45, 0.0  ;;  %v126_v47 = vld [vmem:[#allocation2 + $0x338] sm:$0xff]  ;;  %v128_v54 = vld [vmem:[#allocation2 + $0x348] sm:$0xff] }
  0x51   :  { %vm233_vm2 = vcmp.gt.f32.partialorder %v105_v46, 0.0  ;;  %739 = vst [vmem:[#allocation5 + $0x260] sm:$0xff] %v611_v51  ;;  %740 = vst [vmem:[#allocation5 + $0x268] sm:$0xff] %v612_v52  ;;  %v888_v59 = vsel %vm231_vm0, 1.0, %v992_v6  ;;  %v889_v60 = vsel %vm232_vm1, 1.0, %v992_v6  ;;  %vm234_vm3 = vcmp.gt.f32.partialorder %v106_v50, 0.0 }
  0x52   :  { %741 = vst [vmem:[#allocation5 + $0x270] sm:$0xff] %v613_v53  ;;  %v890_v61 = vsel %vm233_vm2, 1.0, %v992_v6  ;;  %742 = vst [vmem:[#allocation5 + $0x278] sm:$0xff] %v614_v55  ;;  %v615_v63 = vmul.f32 %v888_v59, %v103_v44  ;;  %v616_v0 = vmul.f32 %v889_v60, %v104_v45  ;;  %v891_v2 = vsel %vm234_vm3, 1.0, %v992_v6  ;;  %v127_v53 = vld [vmem:[#allocation2 + $0x340] sm:$0xff]  ;;  %v129_v55 = vld [vmem:[#allocation2 + $0x350] sm:$0xff] }
  0x53   :  { %v617_v1 = vmul.f32 %v890_v61, %v105_v46  ;;  %v618_v3 = vmul.f32 %v891_v2, %v106_v50  ;;  %vm235_vm4 = vcmp.gt.f32.partialorder %v107_v56, 0.0  ;;  %vm236_vm5 = vcmp.gt.f32.partialorder %v108_v57, 0.0  ;;  %v130_v59 = vld [vmem:[#allocation2 + $0x358] sm:$0xff]  ;;  %v132_v2 = vld [vmem:[#allocation2 + $0x368] sm:$0xff] }
  0x54   :  { %vm237_vm6 = vcmp.gt.f32.partialorder %v109_v58, 0.0  ;;  %743 = vst [vmem:[#allocation5 + $0x280] sm:$0xff] %v615_v63  ;;  %744 = vst [vmem:[#allocation5 + $0x288] sm:$0xff] %v616_v0  ;;  %v892_v8 = vsel %vm235_vm4, 1.0, %v992_v6  ;;  %v893_v9 = vsel %vm236_vm5, 1.0, %v992_v6  ;;  %vm238_vm7 = vcmp.gt.f32.partialorder %v110_v62, 0.0 }
  0x55   :  { %745 = vst [vmem:[#allocation5 + $0x290] sm:$0xff] %v617_v1  ;;  %v894_v10 = vsel %vm237_vm6, 1.0, %v992_v6  ;;  %746 = vst [vmem:[#allocation5 + $0x298] sm:$0xff] %v618_v3  ;;  %v619_v12 = vmul.f32 %v892_v8, %v107_v56  ;;  %v620_v13 = vmul.f32 %v893_v9, %v108_v57  ;;  %v895_v15 = vsel %vm238_vm7, 1.0, %v992_v6  ;;  %v131_v1 = vld [vmem:[#allocation2 + $0x360] sm:$0xff]  ;;  %v133_v3 = vld [vmem:[#allocation2 + $0x370] sm:$0xff] }
  0x56   :  { %v621_v14 = vmul.f32 %v894_v10, %v109_v58  ;;  %v622_v16 = vmul.f32 %v895_v15, %v110_v62  ;;  %vm239_vm8 = vcmp.gt.f32.partialorder %v111_v4, 0.0  ;;  %vm240_vm9 = vcmp.gt.f32.partialorder %v112_v5, 0.0  ;;  %v134_v8 = vld [vmem:[#allocation2 + $0x378] sm:$0xff]  ;;  %v136_v15 = vld [vmem:[#allocation2 + $0x388] sm:$0xff] }
  0x57   :  { %vm241_vm10 = vcmp.gt.f32.partialorder %v113_v7, 0.0  ;;  %747 = vst [vmem:[#allocation5 + $0x2a0] sm:$0xff] %v619_v12  ;;  %748 = vst [vmem:[#allocation5 + $0x2a8] sm:$0xff] %v620_v13  ;;  %v896_v20 = vsel %vm239_vm8, 1.0, %v992_v6  ;;  %v897_v21 = vsel %vm240_vm9, 1.0, %v992_v6  ;;  %vm242_vm11 = vcmp.gt.f32.partialorder %v114_v11, 0.0 }
  0x58   :  { %749 = vst [vmem:[#allocation5 + $0x2b0] sm:$0xff] %v621_v14  ;;  %v898_v22 = vsel %vm241_vm10, 1.0, %v992_v6  ;;  %750 = vst [vmem:[#allocation5 + $0x2b8] sm:$0xff] %v622_v16  ;;  %v623_v24 = vmul.f32 %v896_v20, %v111_v4  ;;  %v624_v25 = vmul.f32 %v897_v21, %v112_v5  ;;  %v899_v27 = vsel %vm242_vm11, 1.0, %v992_v6  ;;  %v135_v14 = vld [vmem:[#allocation2 + $0x380] sm:$0xff]  ;;  %v137_v16 = vld [vmem:[#allocation2 + $0x390] sm:$0xff] }
  0x59   :  { %v625_v26 = vmul.f32 %v898_v22, %v113_v7  ;;  %v626_v28 = vmul.f32 %v899_v27, %v114_v11  ;;  %vm243_vm12 = vcmp.gt.f32.partialorder %v115_v17, 0.0  ;;  %vm244_vm13 = vcmp.gt.f32.partialorder %v116_v18, 0.0  ;;  %v138_v20 = vld [vmem:[#allocation2 + $0x398] sm:$0xff]  ;;  %v140_v27 = vld [vmem:[#allocation2 + $0x3a8] sm:$0xff] }
  0x5a   :  { %vm245_vm14 = vcmp.gt.f32.partialorder %v117_v19, 0.0  ;;  %751 = vst [vmem:[#allocation5 + $0x2c0] sm:$0xff] %v623_v24  ;;  %752 = vst [vmem:[#allocation5 + $0x2c8] sm:$0xff] %v624_v25  ;;  %v900_v32 = vsel %vm243_vm12, 1.0, %v992_v6  ;;  %v901_v33 = vsel %vm244_vm13, 1.0, %v992_v6  ;;  %vm246_vm15 = vcmp.gt.f32.partialorder %v118_v23, 0.0 }
  0x5b   :  { %753 = vst [vmem:[#allocation5 + $0x2d0] sm:$0xff] %v625_v26  ;;  %v902_v34 = vsel %vm245_vm14, 1.0, %v992_v6  ;;  %754 = vst [vmem:[#allocation5 + $0x2d8] sm:$0xff] %v626_v28  ;;  %v627_v36 = vmul.f32 %v900_v32, %v115_v17  ;;  %v628_v37 = vmul.f32 %v901_v33, %v116_v18  ;;  %v903_v39 = vsel %vm246_vm15, 1.0, %v992_v6  ;;  %v139_v26 = vld [vmem:[#allocation2 + $0x3a0] sm:$0xff]  ;;  %v141_v28 = vld [vmem:[#allocation2 + $0x3b0] sm:$0xff] }
  0x5c   :  { %v629_v38 = vmul.f32 %v902_v34, %v117_v19  ;;  %v630_v40 = vmul.f32 %v903_v39, %v118_v23  ;;  %vm247_vm0 = vcmp.gt.f32.partialorder %v119_v29, 0.0  ;;  %vm248_vm1 = vcmp.gt.f32.partialorder %v120_v30, 0.0  ;;  %v142_v32 = vld [vmem:[#allocation2 + $0x3b8] sm:$0xff]  ;;  %v144_v39 = vld [vmem:[#allocation2 + $0x3c8] sm:$0xff] }
  0x5d   :  { %vm249_vm2 = vcmp.gt.f32.partialorder %v121_v31, 0.0  ;;  %755 = vst [vmem:[#allocation5 + $0x2e0] sm:$0xff] %v627_v36  ;;  %756 = vst [vmem:[#allocation5 + $0x2e8] sm:$0xff] %v628_v37  ;;  %v904_v44 = vsel %vm247_vm0, 1.0, %v992_v6  ;;  %v905_v45 = vsel %vm248_vm1, 1.0, %v992_v6  ;;  %vm250_vm3 = vcmp.gt.f32.partialorder %v122_v35, 0.0 }
  0x5e   :  { %757 = vst [vmem:[#allocation5 + $0x2f0] sm:$0xff] %v629_v38  ;;  %v906_v46 = vsel %vm249_vm2, 1.0, %v992_v6  ;;  %758 = vst [vmem:[#allocation5 + $0x2f8] sm:$0xff] %v630_v40  ;;  %v631_v48 = vmul.f32 %v904_v44, %v119_v29  ;;  %v632_v49 = vmul.f32 %v905_v45, %v120_v30  ;;  %v907_v51 = vsel %vm250_vm3, 1.0, %v992_v6  ;;  %v143_v38 = vld [vmem:[#allocation2 + $0x3c0] sm:$0xff]  ;;  %v145_v40 = vld [vmem:[#allocation2 + $0x3d0] sm:$0xff] }
  0x5f   :  { %v633_v50 = vmul.f32 %v906_v46, %v121_v31  ;;  %v634_v52 = vmul.f32 %v907_v51, %v122_v35  ;;  %vm251_vm4 = vcmp.gt.f32.partialorder %v123_v41, 0.0  ;;  %vm252_vm5 = vcmp.gt.f32.partialorder %v124_v42, 0.0  ;;  %v146_v44 = vld [vmem:[#allocation2 + $0x3d8] sm:$0xff]  ;;  %v148_v51 = vld [vmem:[#allocation2 + $0x3e8] sm:$0xff] }
  0x60   :  { %vm253_vm6 = vcmp.gt.f32.partialorder %v125_v43, 0.0  ;;  %759 = vst [vmem:[#allocation5 + $0x300] sm:$0xff] %v631_v48  ;;  %760 = vst [vmem:[#allocation5 + $0x308] sm:$0xff] %v632_v49  ;;  %v908_v56 = vsel %vm251_vm4, 1.0, %v992_v6  ;;  %v909_v57 = vsel %vm252_vm5, 1.0, %v992_v6  ;;  %vm254_vm7 = vcmp.gt.f32.partialorder %v126_v47, 0.0 }
  0x61   :  { %761 = vst [vmem:[#allocation5 + $0x310] sm:$0xff] %v633_v50  ;;  %v910_v58 = vsel %vm253_vm6, 1.0, %v992_v6  ;;  %762 = vst [vmem:[#allocation5 + $0x318] sm:$0xff] %v634_v52  ;;  %v635_v60 = vmul.f32 %v908_v56, %v123_v41  ;;  %v636_v61 = vmul.f32 %v909_v57, %v124_v42  ;;  %v911_v63 = vsel %vm254_vm7, 1.0, %v992_v6  ;;  %v147_v50 = vld [vmem:[#allocation2 + $0x3e0] sm:$0xff]  ;;  %v149_v52 = vld [vmem:[#allocation2 + $0x3f0] sm:$0xff] }
  0x62   :  { %v637_v62 = vmul.f32 %v910_v58, %v125_v43  ;;  %v638_v0 = vmul.f32 %v911_v63, %v126_v47  ;;  %vm255_vm8 = vcmp.gt.f32.partialorder %v127_v53, 0.0  ;;  %vm256_vm9 = vcmp.gt.f32.partialorder %v128_v54, 0.0  ;;  %v150_v56 = vld [vmem:[#allocation2 + $0x3f8] sm:$0xff] }
  0x63   :  { %vm257_vm10 = vcmp.gt.f32.partialorder %v129_v55, 0.0  ;;  %763 = vst [vmem:[#allocation5 + $0x320] sm:$0xff] %v635_v60  ;;  %764 = vst [vmem:[#allocation5 + $0x328] sm:$0xff] %v636_v61  ;;  %v912_v4 = vsel %vm255_vm8, 1.0, %v992_v6  ;;  %v913_v5 = vsel %vm256_vm9, 1.0, %v992_v6  ;;  %vm258_vm11 = vcmp.gt.f32.partialorder %v130_v59, 0.0 }
  0x64   :  { %765 = vst [vmem:[#allocation5 + $0x330] sm:$0xff] %v637_v62  ;;  %v914_v7 = vsel %vm257_vm10, 1.0, %v992_v6  ;;  %766 = vst [vmem:[#allocation5 + $0x338] sm:$0xff] %v638_v0  ;;  %v639_v9 = vmul.f32 %v912_v4, %v127_v53  ;;  %v640_v10 = vmul.f32 %v913_v5, %v128_v54  ;;  %v915_v12 = vsel %vm258_vm11, 1.0, %v992_v6 }
  0x65   :  { %v641_v11 = vmul.f32 %v914_v7, %v129_v55  ;;  %v642_v13 = vmul.f32 %v915_v12, %v130_v59  ;;  %vm259_vm12 = vcmp.gt.f32.partialorder %v131_v1, 0.0  ;;  %vm260_vm13 = vcmp.gt.f32.partialorder %v132_v2, 0.0 }
  0x66   :  { %vm261_vm14 = vcmp.gt.f32.partialorder %v133_v3, 0.0  ;;  %767 = vst [vmem:[#allocation5 + $0x340] sm:$0xff] %v639_v9  ;;  %768 = vst [vmem:[#allocation5 + $0x348] sm:$0xff] %v640_v10  ;;  %v916_v17 = vsel %vm259_vm12, 1.0, %v992_v6  ;;  %v917_v18 = vsel %vm260_vm13, 1.0, %v992_v6  ;;  %vm262_vm15 = vcmp.gt.f32.partialorder %v134_v8, 0.0 }
  0x67   :  { %769 = vst [vmem:[#allocation5 + $0x350] sm:$0xff] %v641_v11  ;;  %v918_v19 = vsel %vm261_vm14, 1.0, %v992_v6  ;;  %770 = vst [vmem:[#allocation5 + $0x358] sm:$0xff] %v642_v13  ;;  %v643_v21 = vmul.f32 %v916_v17, %v131_v1  ;;  %v644_v22 = vmul.f32 %v917_v18, %v132_v2  ;;  %v919_v24 = vsel %vm262_vm15, 1.0, %v992_v6 }
  0x68   :  { %v645_v23 = vmul.f32 %v918_v19, %v133_v3  ;;  %v646_v25 = vmul.f32 %v919_v24, %v134_v8  ;;  %vm263_vm0 = vcmp.gt.f32.partialorder %v135_v14, 0.0  ;;  %vm264_vm1 = vcmp.gt.f32.partialorder %v136_v15, 0.0 }
  0x69   :  { %vm265_vm2 = vcmp.gt.f32.partialorder %v137_v16, 0.0  ;;  %771 = vst [vmem:[#allocation5 + $0x360] sm:$0xff] %v643_v21  ;;  %772 = vst [vmem:[#allocation5 + $0x368] sm:$0xff] %v644_v22  ;;  %v920_v29 = vsel %vm263_vm0, 1.0, %v992_v6  ;;  %v921_v30 = vsel %vm264_vm1, 1.0, %v992_v6  ;;  %vm266_vm3 = vcmp.gt.f32.partialorder %v138_v20, 0.0 }
  0x6a   :  { %773 = vst [vmem:[#allocation5 + $0x370] sm:$0xff] %v645_v23  ;;  %v922_v31 = vsel %vm265_vm2, 1.0, %v992_v6  ;;  %774 = vst [vmem:[#allocation5 + $0x378] sm:$0xff] %v646_v25  ;;  %v647_v33 = vmul.f32 %v920_v29, %v135_v14  ;;  %v648_v34 = vmul.f32 %v921_v30, %v136_v15  ;;  %v923_v36 = vsel %vm266_vm3, 1.0, %v992_v6 }
  0x6b   :  { %v649_v35 = vmul.f32 %v922_v31, %v137_v16  ;;  %v650_v37 = vmul.f32 %v923_v36, %v138_v20  ;;  %vm267_vm4 = vcmp.gt.f32.partialorder %v139_v26, 0.0  ;;  %vm268_vm5 = vcmp.gt.f32.partialorder %v140_v27, 0.0 }
  0x6c   :  { %vm269_vm6 = vcmp.gt.f32.partialorder %v141_v28, 0.0  ;;  %775 = vst [vmem:[#allocation5 + $0x380] sm:$0xff] %v647_v33  ;;  %776 = vst [vmem:[#allocation5 + $0x388] sm:$0xff] %v648_v34  ;;  %v924_v41 = vsel %vm267_vm4, 1.0, %v992_v6  ;;  %v925_v42 = vsel %vm268_vm5, 1.0, %v992_v6  ;;  %vm270_vm7 = vcmp.gt.f32.partialorder %v142_v32, 0.0 }
  0x6d   :  { %777 = vst [vmem:[#allocation5 + $0x390] sm:$0xff] %v649_v35  ;;  %v926_v43 = vsel %vm269_vm6, 1.0, %v992_v6  ;;  %778 = vst [vmem:[#allocation5 + $0x398] sm:$0xff] %v650_v37  ;;  %v651_v45 = vmul.f32 %v924_v41, %v139_v26  ;;  %v652_v46 = vmul.f32 %v925_v42, %v140_v27  ;;  %v927_v48 = vsel %vm270_vm7, 1.0, %v992_v6 }
  0x6e   :  { %v653_v47 = vmul.f32 %v926_v43, %v141_v28  ;;  %v654_v49 = vmul.f32 %v927_v48, %v142_v32  ;;  %vm271_vm8 = vcmp.gt.f32.partialorder %v143_v38, 0.0  ;;  %vm272_vm9 = vcmp.gt.f32.partialorder %v144_v39, 0.0 }
  0x6f   :  { %vm273_vm10 = vcmp.gt.f32.partialorder %v145_v40, 0.0  ;;  %779 = vst [vmem:[#allocation5 + $0x3a0] sm:$0xff] %v651_v45  ;;  %780 = vst [vmem:[#allocation5 + $0x3a8] sm:$0xff] %v652_v46  ;;  %v928_v53 = vsel %vm271_vm8, 1.0, %v992_v6  ;;  %v929_v54 = vsel %vm272_vm9, 1.0, %v992_v6  ;;  %vm274_vm11 = vcmp.gt.f32.partialorder %v146_v44, 0.0 }
  0x70   :  { %781 = vst [vmem:[#allocation5 + $0x3b0] sm:$0xff] %v653_v47  ;;  %v930_v55 = vsel %vm273_vm10, 1.0, %v992_v6  ;;  %782 = vst [vmem:[#allocation5 + $0x3b8] sm:$0xff] %v654_v49  ;;  %v655_v57 = vmul.f32 %v928_v53, %v143_v38  ;;  %v656_v58 = vmul.f32 %v929_v54, %v144_v39  ;;  %v931_v60 = vsel %vm274_vm11, 1.0, %v992_v6 }
  0x71   :  { %v657_v59 = vmul.f32 %v930_v55, %v145_v40  ;;  %v658_v61 = vmul.f32 %v931_v60, %v146_v44  ;;  %vm275_vm12 = vcmp.gt.f32.partialorder %v147_v50, 0.0  ;;  %vm276_vm13 = vcmp.gt.f32.partialorder %v148_v51, 0.0 }
  0x72   :  { %vm277_vm14 = vcmp.gt.f32.partialorder %v149_v52, 0.0  ;;  %783 = vst [vmem:[#allocation5 + $0x3c0] sm:$0xff] %v655_v57  ;;  %784 = vst [vmem:[#allocation5 + $0x3c8] sm:$0xff] %v656_v58  ;;  %v932_v62 = vsel %vm275_vm12, 1.0, %v992_v6  ;;  %v933_v63 = vsel %vm276_vm13, 1.0, %v992_v6  ;;  %vm278_vm15 = vcmp.gt.f32.partialorder %v150_v56, 0.0 }
  0x73   :  { %785 = vst [vmem:[#allocation5 + $0x3d0] sm:$0xff] %v657_v59  ;;  %v934_v0 = vsel %vm277_vm14, 1.0, %v992_v6  ;;  %786 = vst [vmem:[#allocation5 + $0x3d8] sm:$0xff] %v658_v61  ;;  %v659_v1 = vmul.f32 %v932_v62, %v147_v50  ;;  %v660_v2 = vmul.f32 %v933_v63, %v148_v51  ;;  %v935_v4 = vsel %vm278_vm15, 1.0, %v992_v6 }
  0x74   :  { %v661_v3 = vmul.f32 %v934_v0, %v149_v52  ;;  %v662_v5 = vmul.f32 %v935_v4, %v150_v56 }
  0x75   :  { %787 = vst [vmem:[#allocation5 + $0x3e0] sm:$0xff] %v659_v1  ;;  %788 = vst [vmem:[#allocation5 + $0x3e8] sm:$0xff] %v660_v2 }
  0x76   :  { %789 = vst [vmem:[#allocation5 + $0x3f0] sm:$0xff] %v661_v3  ;;  %790 = vst [vmem:[#allocation5 + $0x3f8] sm:$0xff] %v662_v5 }
  0x77   :  { %974 = shalt.err (!%p971_p12)
}
  0x78   :  { %s975_s24 = scalar_lea.hbm %s1163_s1, 16384 }
  0x79   :  { %p976_p13 = scmp.ne.s32.totalorder %s1163_s1, %s975_s24  ;;  %p979_p0 = scmp.lt.u32.totalorder %s975_s24, %s1163_s1 }
  0x7b   :  { %p981_p1 = pnand %p979_p0, %p976_p13 }
  0x7d   :  { %984 = shalt.err (!%p981_p1)
}
  0x7e   :  { %802 = dma.vmem_to_hbm [thread:$0]  %s797_s20, 16384, %s1163_s1, [#allocation4], %s990_s16, %s990_s16, %s991_s17  }
  0x7f   :  { %987 = dma.done.wait [#allocation4], 16384  }
  0x80   :  { %988 = vsyncadd [#allocation4], 4294950912 }
  0x81   :  { %806 = vsyncpa [#allocation3], 1 }
  0x82   :  { %807 = vsyncpa [#allocation4], 1 }

</bundles_post_ra>
